<compile_context>
chip_gen: v7x
topology: tpu7x:2x2x1
jax: 0.10.0
libtpu: 0.0.40
codegen_flags: <defaults>
</compile_context>

<pallas_src>
import jax
import jax.numpy as jnp
from jax import lax
from jax.experimental import pallas as pl
from jax.experimental.pallas import tpu as pltpu


def _lora_merged_linear_kernel(x_ref, w_ref, xa_ref, bmat_ref, bias_ref,
                               o_ref, acc_ref):
    """One (TM, TN) output tile; accumulates x @ W.T over the K grid axis,
    applies the (tiny) LoRA term and writes out at the last K step."""
    k = pl.program_id(2)

    @pl.when(k == 0)
    def _():
        # Fold the bias into the accumulator init (once per output tile).
        acc_ref[...] = jnp.broadcast_to(
            bias_ref[...].astype(jnp.float32), acc_ref.shape)

    # Base term: x @ W.T via a transposed contraction — W keeps its
    # nn.Linear (out, in) layout, no in-kernel transpose or padding copy.
    acc_ref[...] += lax.dot_general(
        x_ref[...], w_ref[...],
        dimension_numbers=(((1,), (1,)), ((), ())),
        preferred_element_type=jnp.float32)

    @pl.when(k == pl.num_programs(2) - 1)
    def _():
        # LoRA epilogue, once per (i, j) tile: (alpha * x @ A) @ B.
        # alpha is already folded into XA by the wrapper pre-pass.
        lora = jnp.dot(xa_ref[...], bmat_ref[...],
                       preferred_element_type=jnp.float32)
        o_ref[...] = (acc_ref[...] + lora).astype(o_ref.dtype)


def _round_up(x, m):
    return ((x + m - 1) // m) * m


def _pick_tile(dim, desired, align):
    """Largest tile <= desired that is a multiple of `align` and divides `dim`;
    the full dim when it is small; None if only padding would work."""
    if dim <= desired:
        return dim                      # full-extent block, no padding needed
    t = (desired // align) * align
    while t >= align:
        if dim % t == 0:
            return t
        t -= align
    return None


def lora_merged_linear(x, weight, bias, A, B, alpha, *, tm=256, tn=512, tk=1024):
    """y = F.linear(x, weight + alpha * (A @ B).T, bias) with a Pallas kernel."""
    orig_shape = x.shape
    in_dim = orig_shape[-1]
    out_dim = weight.shape[0]
    rank = A.shape[1]

    x2d = x.reshape(-1, in_dim)
    rows = x2d.shape[0]
    itemsize = jnp.dtype(x.dtype).itemsize

    # dtype-aware sublane alignment for the row (M) axis.
    m_align = {4: 8, 2: 16, 1: 32}.get(itemsize, 8)

    TM = min(tm, _round_up(rows, m_align))
    TN = _pick_tile(out_dim, tn, 128)
    TK = _pick_tile(in_dim, tk, 128)

    # Padding is only a fallback for awkward weight dims (uncommon).
    out_p, in_p = out_dim, in_dim
    if TN is None:
        TN = min(tn, _round_up(out_dim, 128))
        out_p = _round_up(out_dim, TN)
    if TK is None:
        TK = min(tk, _round_up(in_dim, 128))
        in_p = _round_up(in_dim, TK)
    rows_p = _round_up(rows, TM)

    # LoRA pre-pass: XA = alpha * (x @ A) is (rows, rank) — trivial FLOPs,
    # done once outside the kernel so x @ A is never recomputed per (j, k).
    xa = (x2d.astype(jnp.float32) @ A.astype(jnp.float32) * float(alpha)
          ).astype(x.dtype)

    # Pad only what actually needs it (rows of x / XA; weights only on fallback).
    x_p = x2d
    if rows_p != rows or in_p != in_dim:
        x_p = jnp.pad(x2d, ((0, rows_p - rows), (0, in_p - in_dim)))
    xa_p = xa if rows_p == rows else jnp.pad(xa, ((0, rows_p - rows), (0, 0)))
    w_p = weight
    if out_p != out_dim or in_p != in_dim:
        w_p = jnp.pad(weight, ((0, out_p - out_dim), (0, in_p - in_dim)))
    b_p = B if out_p == out_dim else jnp.pad(B, ((0, 0), (0, out_p - out_dim)))
    bias2d = bias.reshape(1, out_dim)
    bias_p = (bias2d if out_p == out_dim
              else jnp.pad(bias2d, ((0, 0), (0, out_p - out_dim))))

    grid = (rows_p // TM, out_p // TN, in_p // TK)

    # VMEM budget: double-buffered input/output blocks + f32 accumulator.
    block_bytes = (
        2 * (TM * TK + TN * TK + TM * rank + rank * TN + TN) * itemsize
        + 2 * TM * TN * itemsize
        + TM * TN * 4)
    vmem_limit = min(64 << 20, max(32 << 20, 2 * block_bytes))

    cost = pl.CostEstimate(
        flops=2 * rows_p * out_p * in_p + 2 * rows_p * rank * out_p,
        transcendentals=0,
        bytes_accessed=(rows_p * in_p + out_p * in_p + rows_p * rank
                        + rank * out_p + out_p + rows_p * out_p) * itemsize)

    y_p = pl.pallas_call(
        _lora_merged_linear_kernel,
        out_shape=jax.ShapeDtypeStruct((rows_p, out_p), x.dtype),
        grid_spec=pltpu.PrefetchScalarGridSpec(
            num_scalar_prefetch=0,
            grid=grid,
            in_specs=[
                pl.BlockSpec((TM, TK), lambda i, j, k: (i, k)),    # x
                pl.BlockSpec((TN, TK), lambda i, j, k: (j, k)),    # W (out, in)
                pl.BlockSpec((TM, rank), lambda i, j, k: (i, 0)),  # XA (tiny)
                pl.BlockSpec((rank, TN), lambda i, j, k: (0, j)),  # B  (tiny)
                pl.BlockSpec((1, TN), lambda i, j, k: (0, j)),     # bias
            ],
            out_specs=pl.BlockSpec((TM, TN), lambda i, j, k: (i, j)),
            scratch_shapes=[pltpu.VMEM((TM, TN), jnp.float32)],
        ),
        compiler_params=pltpu.CompilerParams(
            dimension_semantics=("parallel", "parallel", "arbitrary"),
            vmem_limit_bytes=int(vmem_limit)),
        cost_estimate=cost,
    )(x_p, w_p, xa_p, b_p, bias_p)

    y2d = y_p[:rows, :out_dim]
    return y2d.reshape(*orig_shape[:-1], out_dim)


if __name__ == "__main__":
    # Small, deterministic problem consistent with nn.Linear(32, 64) + LoRA.
    batch, seq = 2, 8
    in_dim, out_dim, rank, alpha = 32, 64, 4, 2.0

    key = jax.random.PRNGKey(0)
    kx, kw, kb, ka, kB = jax.random.split(key, 5)

    x = jax.random.normal(kx, (batch, seq, in_dim), dtype=jnp.float32)
    weight = jax.random.normal(kw, (out_dim, in_dim), dtype=jnp.float32) * 0.1
    bias = jax.random.normal(kb, (out_dim,), dtype=jnp.float32) * 0.1
    # LoRALayer init: A ~ randn / sqrt(rank); B is zeros in the module — use
    # small nonzero values here so the LoRA path is exercised numerically.
    A = jax.random.normal(ka, (in_dim, rank), dtype=jnp.float32) / jnp.sqrt(rank)
    B = jax.random.normal(kB, (rank, out_dim), dtype=jnp.float32) * 0.05

    y = lora_merged_linear(x, weight, bias, A, B, alpha)
    y = jax.block_until_ready(y)

    # Pure-JAX reference of the PyTorch forward (merged-weight formulation).
    combined_w = weight + alpha * (A @ B).T
    y_ref = x @ combined_w.T + bias
    assert y.shape == (batch, seq, out_dim)
    assert jnp.allclose(y, y_ref, atol=1e-4, rtol=1e-4), "mismatch vs reference"

    print("KERNEL_OK")
</pallas_src>

<mosaic_0001>
module attributes {stable_mosaic.version = 11 : i64} {
  func.func @_lora_merged_linear_kernel(%arg0: i32, %arg1: i32, %arg2: i32, %arg3: memref<16x32xf32, #tpu.memory_space<vmem>>, %arg4: memref<64x32xf32, #tpu.memory_space<vmem>>, %arg5: memref<16x4xf32, #tpu.memory_space<vmem>>, %arg6: memref<4x64xf32, #tpu.memory_space<vmem>>, %arg7: memref<1x64xf32, #tpu.memory_space<vmem>>, %arg8: memref<16x64xf32, #tpu.memory_space<vmem>>, %arg9: memref<16x64xf32, #tpu.memory_space<vmem>>) attributes {dimension_semantics = [#tpu.dimension_semantics<parallel>, #tpu.dimension_semantics<parallel>, #tpu.dimension_semantics<arbitrary>], iteration_bounds = array<i64: 1, 1, 1>, scalar_prefetch = 0 : i64, scratch_operands = 1 : i64, tpu.core_type = #tpu.core_type<tc>, window_params = [{transform_indices = @transform_0, window_bounds = array<i64: 16, 32>}, {transform_indices = @transform_1, window_bounds = array<i64: 64, 32>}, {transform_indices = @transform_2, window_bounds = array<i64: 16, 4>}, {transform_indices = @transform_3, window_bounds = array<i64: 4, 64>}, {transform_indices = @transform_4, window_bounds = array<i64: 1, 64>}, {transform_indices = @transform_5, window_bounds = array<i64: 16, 64>}]} {
    %c0_i32 = arith.constant 0 : i32
    %0 = arith.cmpi eq, %arg2, %c0_i32 : i32
    %1 = arith.extui %0 : i1 to i32
    %c0_i32_0 = arith.constant 0 : i32
    %2 = arith.cmpi ne, %1, %c0_i32_0 : i32
    scf.if %2 {
      %c0_10 = arith.constant 0 : index
      %c0_11 = arith.constant 0 : index
      %12 = vector.load %arg7[%c0_10, %c0_11] : memref<1x64xf32, #tpu.memory_space<vmem>>, vector<1x64xf32>
      %13 = vector.shape_cast %12 : vector<1x64xf32> to vector<1x64xf32>
      %14 = vector.broadcast %13 : vector<1x64xf32> to vector<16x64xf32>
      %c0_12 = arith.constant 0 : index
      %c0_13 = arith.constant 0 : index
      %15 = vector.load %arg9[%c0_12, %c0_13] : memref<16x64xf32, #tpu.memory_space<vmem>>, vector<16x64xf32>
      tpu.vector_store %arg9[%c0_12, %c0_13], %14 {strides = array<i32>} : memref<16x64xf32, #tpu.memory_space<vmem>>, vector<16x64xf32>,
    } else {
    }
    %c0 = arith.constant 0 : index
    %c0_1 = arith.constant 0 : index
    %3 = vector.load %arg9[%c0, %c0_1] : memref<16x64xf32, #tpu.memory_space<vmem>>, vector<16x64xf32>
    %c0_2 = arith.constant 0 : index
    %c0_3 = arith.constant 0 : index
    %4 = vector.load %arg3[%c0_2, %c0_3] : memref<16x32xf32, #tpu.memory_space<vmem>>, vector<16x32xf32>
    %c0_4 = arith.constant 0 : index
    %c0_5 = arith.constant 0 : index
    %5 = vector.load %arg4[%c0_4, %c0_5] : memref<64x32xf32, #tpu.memory_space<vmem>>, vector<64x32xf32>
    %cst = arith.constant dense<0.000000e+00> : vector<16x64xf32>
    %6 = tpu.matmul %4, %5, %cst {dimension_numbers = #tpu.dot_dimension_numbers<[1], [1], [0], [0], [0, 0, 1, 0], [], []>} : vector<16x32xf32>, vector<64x32xf32>, vector<16x64xf32> -> vector<16x64xf32>
    %7 = arith.addf %3, %6 : vector<16x64xf32>
    %c0_6 = arith.constant 0 : index
    %c0_7 = arith.constant 0 : index
    %8 = vector.load %arg9[%c0_6, %c0_7] : memref<16x64xf32, #tpu.memory_space<vmem>>, vector<16x64xf32>
    tpu.vector_store %arg9[%c0_6, %c0_7], %7 {strides = array<i32>} : memref<16x64xf32, #tpu.memory_space<vmem>>, vector<16x64xf32>,
    %c0_i32_8 = arith.constant 0 : i32
    %9 = arith.cmpi eq, %arg2, %c0_i32_8 : i32
    %10 = arith.extui %9 : i1 to i32
    %c0_i32_9 = arith.constant 0 : i32
    %11 = arith.cmpi ne, %10, %c0_i32_9 : i32
    scf.if %11 {
      %c0_10 = arith.constant 0 : index
      %c0_11 = arith.constant 0 : index
      %12 = vector.load %arg5[%c0_10, %c0_11] : memref<16x4xf32, #tpu.memory_space<vmem>>, vector<16x4xf32>
      %c0_12 = arith.constant 0 : index
      %c0_13 = arith.constant 0 : index
      %13 = vector.load %arg6[%c0_12, %c0_13] : memref<4x64xf32, #tpu.memory_space<vmem>>, vector<4x64xf32>
      %cst_14 = arith.constant dense<0.000000e+00> : vector<16x64xf32>
      %14 = tpu.matmul %12, %13, %cst_14 {dimension_numbers = #tpu.dot_dimension_numbers<[1], [0], [0], [1], [0, 0, 1, 1], [], []>} : vector<16x4xf32>, vector<4x64xf32>, vector<16x64xf32> -> vector<16x64xf32>
      %c0_15 = arith.constant 0 : index
      %c0_16 = arith.constant 0 : index
      %15 = vector.load %arg9[%c0_15, %c0_16] : memref<16x64xf32, #tpu.memory_space<vmem>>, vector<16x64xf32>
      %16 = arith.addf %15, %14 : vector<16x64xf32>
      %c0_17 = arith.constant 0 : index
      %c0_18 = arith.constant 0 : index
      %17 = vector.load %arg8[%c0_17, %c0_18] : memref<16x64xf32, #tpu.memory_space<vmem>>, vector<16x64xf32>
      tpu.vector_store %arg8[%c0_17, %c0_18], %16 {strides = array<i32>} : memref<16x64xf32, #tpu.memory_space<vmem>>, vector<16x64xf32>,
    } else {
    }
    return
  }
  func.func @transform_0(%arg0: i32, %arg1: i32, %arg2: i32) -> (i32, i32) {
    %c0_i32 = arith.constant 0 : i32
    return %arg0, %arg2 : i32, i32
  }
  func.func @transform_1(%arg0: i32, %arg1: i32, %arg2: i32) -> (i32, i32) {
    %c0_i32 = arith.constant 0 : i32
    return %arg1, %arg2 : i32, i32
  }
  func.func @transform_2(%arg0: i32, %arg1: i32, %arg2: i32) -> (i32, i32) {
    %c0_i32 = arith.constant 0 : i32
    %c0_i32_0 = arith.constant 0 : i32
    return %arg0, %c0_i32 : i32, i32
  }
  func.func @transform_3(%arg0: i32, %arg1: i32, %arg2: i32) -> (i32, i32) {
    %c0_i32 = arith.constant 0 : i32
    %c0_i32_0 = arith.constant 0 : i32
    return %c0_i32, %arg1 : i32, i32
  }
  func.func @transform_4(%arg0: i32, %arg1: i32, %arg2: i32) -> (i32, i32) {
    %c0_i32 = arith.constant 0 : i32
    %c0_i32_0 = arith.constant 0 : i32
    return %c0_i32, %arg1 : i32, i32
  }
  func.func @transform_5(%arg0: i32, %arg1: i32, %arg2: i32) -> (i32, i32) {
    %c0_i32 = arith.constant 0 : i32
    return %arg0, %arg1 : i32, i32
  }
}

</mosaic_0001>

<bundles_post_ra>
// kernel: tpu_custom_call.1
= control target key start
LH: loop header
LB: loop body
LE: loop exit
PB: predicated region body
PF: predicated region fallthrough
CT: control target
= control target key end

     0   :  { %vm47_vm0 = vcmask 261120   ;;  %vm171_vm2 = vcmask 1043456   ;;  %vm32_vm3 = vcmask 523264   ;;  %vm164_vm4 = vcmask 31744   ;;  %s493_s0 = inlined_call_operand.vmem [shape: f32[16,32], index: 0, kind: input, shape index: {}]   ;;  %s494_s1 = inlined_call_operand.vmem [shape: f32[64,32], index: 1, kind: input, shape index: {}]   ;;  %s495_s2 = inlined_call_operand.vmem [shape: f32[16,4], index: 2, kind: input, shape index: {}]   ;;  %s496_s3 = inlined_call_operand.vmem [shape: f32[4,64], index: 3, kind: input, shape index: {}]   ;;  %s497_s4 = inlined_call_operand.vmem [shape: f32[1,64], index: 4, kind: input, shape index: {}]   ;;  %s498_s5 = inlined_call_operand.hbm [shape: f32[16,64], index: 5, kind: output, shape index: {}]  }
   0x1   :  { %v39_v0 = vld [vmem:[%s494_s1] sm:$0xff]  ;;  %v40_v1 = vld [vmem:[%s494_s1 + $0x8] sm:$0xff]  ;;  %v41_v2 = vld [vmem:[%s494_s1 + $0x10] sm:$0xff] }
   0x2   :  { %v323_v3 = vpack.c.bf16 %v40_v1, %v39_v0  ;;  %vm418_vm1 = vmpackc.low %vm47_vm0, %vm47_vm0  ;;  %v42_v5 = vld [vmem:[%s494_s1 + $0x18] sm:$0xff]  ;;  %v37_v7 = vld [vmem:[%s493_s0] sm:$0xff] }
   0x3   :  { %v329_v6 = vpack.c.bf16 %v42_v5, %v41_v2  ;;  %v163_v8 = vld [vmem:[%s496_s3] sm:$0xf]  ;;  %315 = vmatprep.mubr.msk.f32.mxu0 %vm47_vm0, %v37_v7  ;;  %v162_v10 = vld [vmem:[%s495_s2 + $0x8] sm:$0xff] }
   0x4   :  { %325 = vmatprep.subr.msk.bf16.mxu0 %vm418_vm1, %v323_v3  ;;  %v161_v9 = vld [vmem:[%s495_s2] sm:$0xff]  ;;  %318 = vmatprep.subr.msk.mxu1 %vm171_vm2, %v163_v8 }
   0x5   :  { %328 = vmatpush3.bf16.xpose.msk.msra.mxu0 %vm418_vm1, %v323_v3  ;;  %v272_v11 = vld [vmem:[%s497_s4] ss:$0 sm:$0xff] }
   0x6   :  { %331 = vmatprep.subr.msk.bf16.mxu0 %vm418_vm1, %v329_v6  ;;  %34 = vst.msk [vmem:[#allocation2 + $0x8] sm:$0xff] %vm32_vm3, %v272_v11  ;;  %33 = vst.msk [vmem:[#allocation2] sm:$0xff] %vm32_vm3, %v272_v11 }
   0x7   :  { %10 = vsyncpa [#allocation4], 0  ;;  %v43_v12 = vld [vmem:[%s494_s1 + $0x20] sm:$0xff]  ;;  %v44_v13 = vld [vmem:[%s494_s1 + $0x28] sm:$0xff]  ;;  %319 = vmatpush3.msk.msra.mxu1 %vm171_vm2, %v163_v8  ;;  %320 = vmatprep.mubr.msk.f32.mxu1 %vm164_vm4, %v161_v9 }
   0x8   :  { %321 = vmatmul.mubr.msk.f32.vlgmr.msra.gmra.mrb[0].mxu1 %vm164_vm4, %v162_v10  ;;  %v335_v14 = vpack.c.bf16 %v44_v13, %v43_v12  ;;  %v45_v15 = vld [vmem:[%s494_s1 + $0x30] sm:$0xff]  ;;  %v46_v16 = vld [vmem:[%s494_s1 + $0x38] sm:$0xff]  ;;  %v38_v18 = vld [vmem:[%s493_s0 + $0x8] sm:$0xff]  ;;  %s374_s1 = smov [#allocation3]  }
   0x9   :  { %v341_v17 = vpack.c.bf16 %v46_v16, %v45_v15  ;;  %s261_s18 = sshll.u32 %s374_s1, 4  ;;  %s262_s18 = int_to_ptr.vmem [resolvable:$true] %s261_s18 }
   0xa   :  { %s350_s0 = scalar_lea.vmem %s262_s18, 256  ;;  %p355_p1 = scmp.lt.s32.totalorder %s262_s18, %s262_s18 }
   0xb   :  { %p351_p0 = scmp.ne.s32.totalorder %s262_s18, %s350_s0  ;;  %p356_p2 = scmp.lt.s32.totalorder %s350_s0, %s350_s0 }
   0xd   :  { %334 = vmatpush3.bf16.xpose.msk.msra.mxu0 %vm418_vm1, %v329_v6  ;;  %v36_v21 = vld [vmem:[#allocation2 + $0x8] sm:$0xff]  ;;  %v35_v22 = vld [vmem:[#allocation2] sm:$0xff]  ;;  %p357_p3 = por %p356_p2, %p355_p1 }
   0xe   :  { %337 = vmatprep.subr.msk.bf16.mxu0 %vm418_vm1, %v335_v14 }
   0xf   :  { %p358_p4 = pnand %p357_p3, %p351_p0 }
  0x15   :  { %340 = vmatpush3.bf16.xpose.msk.msra.mxu0 %vm418_vm1, %v335_v14 }
  0x16   :  { %343 = vmatprep.subr.msk.bf16.mxu0 %vm418_vm1, %v341_v17 }
  0x1d   :  { %346 = vmatpush3.bf16.xpose.msk.msra.mxu0 %vm418_vm1, %v341_v17 }
  0x24   :  { %316 = vmatmul.mubr.msk.f32.vlgmr.msra.gmra.mrb[0].mxu0 %vm47_vm0, %v38_v18 }
  0xdb   :  { %v322_v19 = vpop.f32.mrb[0].mxu1 }
  0xdc   :  { %v241_v20 = vpop.f32.mrb[1].mxu1 }
  0xf7   :  { %v317_v23 = vpop.f32.mrb[0].mxu0 }
  0xf8   :  { %v154_v24 = vadd.f32 %v317_v23, %v36_v21  ;;  %v144_v25 = vpop.f32.mrb[1].mxu0 }
  0xf9   :  { %v153_v26 = vadd.f32 %v144_v25, %v35_v22 }
  0xfa   :  { %157 = vst.msk [vmem:[#allocation2 + $0x8] sm:$0xff] %vm32_vm3, %v154_v24 }
  0xfb   :  { %156 = vst.msk [vmem:[#allocation2] sm:$0xff] %vm32_vm3, %v153_v26 }
 0x101   :  { %v251_v27 = vld [vmem:[#allocation2 + $0x8] sm:$0xff] }
 0x102   :  { %v253_v28 = vadd.f32 %v322_v19, %v251_v27  ;;  %v250_v29 = vld [vmem:[#allocation2] sm:$0xff] }
 0x103   :  { %v252_v30 = vadd.f32 %v250_v29, %v241_v20 }
 0x104   :  { %255 = vst.msk [vmem:[#allocation3 + $0x8] sm:$0xff] %vm32_vm3, %v253_v28 }
 0x105   :  { %254 = vst.msk [vmem:[#allocation3] sm:$0xff] %vm32_vm3, %v252_v30 }
 0x106   :  { %361 = shalt.err (!%p358_p4)
}
 0x107   :  { %s362_s21 = scalar_lea.hbm %s498_s5, 256 }
 0x108   :  { %p363_p5 = scmp.ne.s32.totalorder %s498_s5, %s362_s21  ;;  %p366_p6 = scmp.lt.u32.totalorder %s362_s21, %s498_s5 }
 0x10a   :  { %p368_p7 = pnand %p366_p6, %p363_p5 }
 0x10c   :  { %371 = shalt.err (!%p368_p7)
}
 0x10d   :  { %s375_s26 = smov 128   ;;  %s376_s27 = smov 8  }
 0x10e   :  { %267 = dma.vmem_to_hbm [thread:$0]  %s262_s18, 256, %s498_s5, [#allocation4], %s375_s26, %s375_s26, %s376_s27  }
 0x10f   :  { %372 = dma.done.wait [#allocation4], 256  }
 0x110   :  { %373 = vsyncadd [#allocation4], 4294967040 }
 0x111   :  { %271 = vsyncpa [#allocation4], 1 }

</bundles_post_ra>
